<compile_context>
chip_gen: v7x
topology: tpu7x:2x2x1
jax: 0.10.0
libtpu: 0.0.40
codegen_flags: <defaults>
</compile_context>

<pallas_src>
import functools

import jax
import jax.numpy as jnp
from jax.experimental import pallas as pl
from jax.experimental.pallas import tpu as pltpu


def _round_up(x, m):
    return ((x + m - 1) // m) * m


def _rmsnorm_kernel(x_ref, w_ref, o_ref, *, eps, inv_d):
    # x_ref: (tm, Dp)   w_ref: (1, Dp)   o_ref: (tm, Dp)
    x = x_ref[...]
    xf = x.astype(jnp.float32)
    # Padded columns are zero -> they do not perturb the sum of squares.
    # inv_d is 1/D for the *unpadded* hidden size (compile-time constant).
    var = jnp.sum(xf * xf, axis=-1, keepdims=True) * inv_d + eps
    xn = (xf * jax.lax.rsqrt(var)).astype(x.dtype)       # cast back to input dtype
    o_ref[...] = (xn * w_ref[...]).astype(o_ref.dtype)


def _vmem_capacity_bytes():
    try:
        return int(pltpu.get_tpu_info().vmem_capacity_bytes)
    except Exception:
        # Conservative fallback (v7x per-TC capacity) if info is unavailable.
        return 64 * 1024 * 1024


def _pick_row_tile(rows, d_padded, in_itemsize, out_itemsize, vmem_cap):
    # Per-row VMEM footprint: double-buffered input + double-buffered output
    # plus ~2x f32 temporaries (xf and the normalized product).
    per_row = d_padded * (2 * in_itemsize + 2 * out_itemsize + 2 * 4)
    budget = int(vmem_cap * 0.6)
    tm = budget // max(per_row, 1)
    tm = max(16, min(tm, 1024))
    tm = (tm // 16) * 16                       # sublane-packing friendly (bf16 & f32)
    tm = min(tm, _round_up(rows, 16))          # never wider than the row count
    return max(tm, 16)


def rms_norm(x, weight, *, eps, constant_bias=0.0, out_dtype=None):
    """RMSNorm over the last axis of `x` with per-feature `weight`."""
    orig_shape = x.shape
    D = orig_shape[-1]
    assert weight.shape == (D,)

    out_dtype = out_dtype or x.dtype

    # Fold constant_bias into the weight once (torch computes weight + bias in
    # the weight's dtype).
    w_eff = weight if constant_bias == 0.0 else weight + jnp.asarray(
        constant_bias, dtype=weight.dtype
    )

    rows = 1
    for s in orig_shape[:-1]:
        rows *= s
    x2d = x.reshape(rows, D)

    # Pad the hidden dim to a lane-dense multiple of 128 (exact: zero columns
    # contribute 0 to the sum of squares and produce 0 outputs, sliced off).
    Dp = _round_up(D, 128)
    if Dp != D:
        x2d = jnp.pad(x2d, ((0, 0), (0, Dp - D)))
        w_eff = jnp.pad(w_eff, (0, Dp - D))
    w2d = w_eff.reshape(1, Dp)

    in_itemsize = jnp.dtype(x.dtype).itemsize
    out_itemsize = jnp.dtype(out_dtype).itemsize
    vmem_cap = _vmem_capacity_bytes()
    tm = _pick_row_tile(rows, Dp, in_itemsize, out_itemsize, vmem_cap)
    # TODO(synk): if a single (tm=16, Dp) tile ever exceeds VMEM (hidden sizes
    # in the millions), a two-pass column-tiled reduction would be needed.

    # Pad rows so the grid covers everything; zero rows are harmless
    # (var = eps > 0, outputs sliced away). No-op when already divisible.
    rows_p = _round_up(rows, tm)
    if rows_p != rows:
        x2d = jnp.pad(x2d, ((0, rows_p - rows), (0, 0)))

    kernel = functools.partial(
        _rmsnorm_kernel, eps=float(eps), inv_d=1.0 / float(D)
    )

    cost = pl.CostEstimate(
        flops=3 * rows * D,
        transcendentals=rows,
        bytes_accessed=rows * D * (in_itemsize + out_itemsize)
        + D * jnp.dtype(weight.dtype).itemsize,
    )

    vmem_limit = min(int(vmem_cap * 0.75), 100 * 1024 * 1024)

    y2d = pl.pallas_call(
        kernel,
        out_shape=jax.ShapeDtypeStruct((rows_p, Dp), out_dtype),
        grid_spec=pltpu.PrefetchScalarGridSpec(
            num_scalar_prefetch=0,
            grid=(rows_p // tm,),
            in_specs=[
                pl.BlockSpec((tm, Dp), lambda i: (i, 0)),
                pl.BlockSpec((1, Dp), lambda i: (0, 0)),   # fetched once, stays resident
            ],
            out_specs=pl.BlockSpec((tm, Dp), lambda i: (i, 0)),
        ),
        compiler_params=pltpu.CompilerParams(
            dimension_semantics=("parallel",),
            vmem_limit_bytes=vmem_limit,
        ),
        cost_estimate=cost,
    )(x2d, w2d)

    return y2d[:rows, :D].reshape(orig_shape)


def _reference(x, weight, *, eps, constant_bias, out_dtype):
    xf = x.astype(jnp.float32)
    var = jnp.mean(xf * xf, axis=-1, keepdims=True) + eps
    xn = (xf * jax.lax.rsqrt(var)).astype(x.dtype)
    w = weight if constant_bias == 0.0 else weight + jnp.asarray(
        constant_bias, dtype=weight.dtype
    )
    return (xn * w).astype(out_dtype)


if __name__ == "__main__":
    key = jax.random.PRNGKey(0)
    kx, kw, kx2, kw2 = jax.random.split(key, 4)

    # --- Check 1: bf16, lane-dense hidden (typical LLM layer, small shape). ---
    batch, seq, hidden = 2, 8, 128
    eps = 1e-6
    x = jax.random.normal(kx, (batch, seq, hidden), dtype=jnp.float32).astype(
        jnp.bfloat16
    )
    weight = (
        1.0 + 0.1 * jax.random.normal(kw, (hidden,), dtype=jnp.float32)
    ).astype(jnp.bfloat16)

    rms1 = jax.jit(
        lambda a, w: rms_norm(a, w, eps=eps, constant_bias=0.0,
                              out_dtype=jnp.bfloat16)
    )
    y = rms1(x, weight)
    jax.block_until_ready(y)
    y_ref = _reference(x, weight, eps=eps, constant_bias=0.0,
                       out_dtype=jnp.bfloat16)
    assert y.shape == x.shape
    assert jnp.allclose(
        y.astype(jnp.float32), y_ref.astype(jnp.float32), atol=1e-2, rtol=1e-2
    )

    # --- Check 2: f32 input, non-128 hidden, non-divisible rows, bias fold. ---
    batch2, seq2, hidden2 = 3, 5, 96
    eps2 = 1e-5
    cbias = 0.5
    x2 = jax.random.normal(kx2, (batch2, seq2, hidden2), dtype=jnp.float32)
    w2 = 1.0 + 0.1 * jax.random.normal(kw2, (hidden2,), dtype=jnp.float32)

    rms2 = jax.jit(
        lambda a, w: rms_norm(a, w, eps=eps2, constant_bias=cbias,
                              out_dtype=jnp.bfloat16)
    )
    y2 = rms2(x2, w2)
    jax.block_until_ready(y2)
    y2_ref = _reference(
        x2, w2, eps=eps2, constant_bias=cbias, out_dtype=jnp.bfloat16
    )
    assert y2.shape == x2.shape
    assert jnp.allclose(
        y2.astype(jnp.float32), y2_ref.astype(jnp.float32), atol=1e-2, rtol=1e-2
    )

    print("KERNEL_OK")
</pallas_src>

<mosaic_0001>
module attributes {stable_mosaic.version = 11 : i64} {
  func.func @_rmsnorm_kernel(%arg0: i32, %arg1: memref<16x128xbf16, #tpu.memory_space<vmem>>, %arg2: memref<1x128xbf16, #tpu.memory_space<vmem>>, %arg3: memref<16x128xbf16, #tpu.memory_space<vmem>>) attributes {dimension_semantics = [#tpu.dimension_semantics<parallel>], iteration_bounds = array<i64: 1>, scalar_prefetch = 0 : i64, scratch_operands = 0 : i64, tpu.core_type = #tpu.core_type<tc>, window_params = [{transform_indices = @transform_0, window_bounds = array<i64: 16, 128>}, {pipeline_mode = #tpu.pipeline_mode<synchronous>, transform_indices = @transform_1, window_bounds = array<i64: 1, 128>}, {transform_indices = @transform_2, window_bounds = array<i64: 16, 128>}]} {
    %c0 = arith.constant 0 : index
    %c0_0 = arith.constant 0 : index
    %0 = vector.load %arg1[%c0, %c0_0] : memref<16x128xbf16, #tpu.memory_space<vmem>>, vector<16x128xbf16>
    %1 = arith.extf %0 : vector<16x128xbf16> to vector<16x128xf32>
    %2 = arith.mulf %1, %1 : vector<16x128xf32>
    %cst = arith.constant dense<0.000000e+00> : vector<16xf32>
    %3 = vector.multi_reduction <add>, %2, %cst [1] : vector<16x128xf32> to vector<16xf32>
    %4 = vector.shape_cast %3 : vector<16xf32> to vector<16x1xf32>
    %cst_1 = arith.constant 7.812500e-03 : f32
    %5 = vector.broadcast %cst_1 : f32 to vector<16x1xf32>
    %6 = arith.mulf %4, %5 : vector<16x1xf32>
    %cst_2 = arith.constant 9.99999997E-7 : f32
    %7 = vector.broadcast %cst_2 : f32 to vector<16x1xf32>
    %8 = arith.addf %6, %7 : vector<16x1xf32>
    %9 = math.rsqrt %8 : vector<16x1xf32>
    %10 = vector.broadcast %9 : vector<16x1xf32> to vector<16x128xf32>
    %11 = arith.mulf %1, %10 : vector<16x128xf32>
    %12 = arith.truncf %11 : vector<16x128xf32> to vector<16x128xbf16>
    %c0_3 = arith.constant 0 : index
    %c0_4 = arith.constant 0 : index
    %13 = vector.load %arg2[%c0_3, %c0_4] : memref<1x128xbf16, #tpu.memory_space<vmem>>, vector<1x128xbf16>
    %14 = vector.broadcast %13 : vector<1x128xbf16> to vector<16x128xbf16>
    %15 = arith.mulf %12, %14 : vector<16x128xbf16>
    %c0_5 = arith.constant 0 : index
    %c0_6 = arith.constant 0 : index
    %16 = vector.load %arg3[%c0_5, %c0_6] : memref<16x128xbf16, #tpu.memory_space<vmem>>, vector<16x128xbf16>
    tpu.vector_store %arg3[%c0_5, %c0_6], %15 {strides = array<i32>} : memref<16x128xbf16, #tpu.memory_space<vmem>>, vector<16x128xbf16>,
    return
  }
  func.func @transform_0(%arg0: i32) -> (i32, i32) {
    %c0_i32 = arith.constant 0 : i32
    %c0_i32_0 = arith.constant 0 : i32
    return %arg0, %c0_i32 : i32, i32
  }
  func.func @transform_1(%arg0: i32) -> (i32, i32) {
    %c0_i32 = arith.constant 0 : i32
    %c0_i32_0 = arith.constant 0 : i32
    %c0_i32_1 = arith.constant 0 : i32
    return %c0_i32, %c0_i32_0 : i32, i32
  }
  func.func @transform_2(%arg0: i32) -> (i32, i32) {
    %c0_i32 = arith.constant 0 : i32
    %c0_i32_0 = arith.constant 0 : i32
    return %arg0, %c0_i32 : i32, i32
  }
}

</mosaic_0001>

<bundles_post_ra>
// kernel: _lambda_.1
= control target key start
LH: loop header
LB: loop body
LE: loop exit
PB: predicated region body
PF: predicated region fallthrough
CT: control target
= control target key end

     0   :  { %7 = vsyncpa [#allocation3], 0  ;;  %s194_s0 = inlined_call_operand.hbm [shape: bf16[16,128], index: 0, kind: input, shape index: {}]   ;;  %s195_s1 = inlined_call_operand.vmem [shape: bf16[1,128], index: 1, kind: input, shape index: {}]   ;;  %s196_s2 = inlined_call_operand.hbm [shape: bf16[16,128], index: 2, kind: output, shape index: {}]  }
   0x1   :  { %8 = vsyncpa [#allocation4], 0  ;;  %s142_s9 = smov [#allocation2]   ;;  %s94_s13 = scalar_lea.hbm %s194_s0, 128 }
   0x2   :  { %s14_s10 = sshll.u32 %s142_s9, 4  ;;  %p95_p0 = scmp.ne.s32.totalorder %s194_s0, %s94_s13  ;;  %s15_s10 = int_to_ptr.vmem [resolvable:$true] %s14_s10 }
   0x3   :  { %p98_p1 = scmp.lt.u32.totalorder %s94_s13, %s194_s0 }
   0x5   :  { %p100_p2 = pnand %p98_p1, %p95_p0 }
   0x7   :  { %103 = shalt.err (!%p100_p2)
}
   0x8   :  { %s104_s18 = scalar_lea.vmem %s15_s10, 128  ;;  %p109_p4 = scmp.lt.s32.totalorder %s15_s10, %s15_s10 }
   0x9   :  { %p105_p3 = scmp.ne.s32.totalorder %s15_s10, %s104_s18  ;;  %p110_p5 = scmp.lt.s32.totalorder %s104_s18, %s104_s18 }
   0xb   :  { %p111_p6 = por %p110_p5, %p109_p4 }
   0xd   :  { %p112_p7 = pnand %p111_p6, %p105_p3 }
   0xf   :  { %115 = shalt.err (!%p112_p7)
}
  0x10   :  { %s143_s19 = smov 64   ;;  %s144_s20 = smov 4  }
  0x11   :  { %20 = dma.hbm_to_vmem [thread:$0]  %s194_s0, 128, %s15_s10, [#allocation3], %s143_s19, %s143_s19, %s144_s20  }
  0x12   :  { %138 = dma.done.wait [#allocation3], 128  }
  0x13   :  { %139 = vsyncadd [#allocation3], 4294967168  ;;  %v83_v0 = vld [vmem:[#allocation2] sm:$0xff]   ;;  %v49_v11 = vlaneseq  ;;  %s145_s24 = smov [#allocation5]  }
  0x14   :  { %v84_v1 = vunpack.c.l.bf16 %v83_v0  ;;  %v85_v2 = vunpack.c.h.bf16 %v83_v0  ;;  %v45_v13 = vld [vmem:[%s195_s1] sm:$0x1]  ;;  %s68_s25 = sshll.u32 %s145_s24, 4  ;;  %s69_s25 = int_to_ptr.vmem [resolvable:$true] %s68_s25 }
  0x15   :  { %v50_v12 = vshrl.u32 %v49_v11, 7  ;;  %v47_v14 = vpack.i.b16 %v45_v13, %v45_v13  ;;  %s116_s26 = scalar_lea.vmem %s69_s25, 128  ;;  %p121_p9 = scmp.lt.s32.totalorder %s69_s25, %s69_s25 }
  0x16   :  { %v30_v3 = vmul.f32 %v84_v1, %v84_v1  ;;  %v31_v4 = vmul.f32 %v85_v2, %v85_v2  ;;  %p117_p8 = scmp.ne.s32.totalorder %s69_s25, %s116_s26  ;;  %p122_p10 = scmp.lt.s32.totalorder %s116_s26, %s116_s26 }
  0x17   :  { %v51_v15 = vsub.s32 0, %v50_v12 }
  0x18   :  { %32 = vadd.xlane.f32.xlu0 %v30_v3  ;;  %p123_p11 = por %p122_p10, %p121_p9 }
  0x19   :  { %v52_v20 = vrot.slane %v47_v14, %v51_v15 }
  0x1a   :  { %p124_p12 = pnand %p123_p11, %p117_p8 }
  0x1c   :  { %34 = vadd.xlane.f32.xlu0 %v31_v4 }
  0xa5   :  { %v33_v5 = vpop.xlane.xlu0 %32 }
  0xa6   :  { %v36_v6 = vmul.f32 0.0078125, %v33_v5 }
  0xa8   :  { %v38_v7 = vadd.f32 1e-06, %v36_v6 }
  0xa9   :  { %v35_v8 = vpop.xlane.xlu0 %34 }
  0xaa   :  { %v37_v9 = vmul.f32 0.0078125, %v35_v8  ;;  %90 = vrsqrt.f32 %v38_v7 }
  0xac   :  { %v39_v10 = vadd.f32 1e-06, %v37_v9 }
  0xae   :  { %92 = vrsqrt.f32 %v39_v10 }
  0xb4   :  { %v91_v16 = vpop.eup %90 }
  0xb5   :  { %v42_v18 = vmul.f32 %v91_v16, %v84_v1 }
  0xb8   :  { %v93_v17 = vpop.eup %92 }
  0xb9   :  { %v43_v19 = vmul.f32 %v93_v17, %v85_v2 }
  0xbb   :  { %v44_v21 = vpack.c.bf16 %v43_v19, %v42_v18 }
  0xbd   :  { %v53_v22 = vmul.bf16 %v52_v20, %v44_v21 }
  0xbf   :  { %v80_v23 = vcombine.low %v53_v22, %v53_v22  ;;  %v81_v24 = vcombine.high %v53_v22, %v53_v22 }
  0xc1   :  { %61 = vst [vmem:[#allocation5] sm:$0xf] %v80_v23  ;;  %62 = vst [vmem:[#allocation5 + $0x4] sm:$0xf] %v81_v24 }
  0xc2   :  { %127 = shalt.err (!%p124_p12)
}
  0xc3   :  { %s128_s28 = scalar_lea.hbm %s196_s2, 128 }
  0xc4   :  { %p129_p13 = scmp.ne.s32.totalorder %s196_s2, %s128_s28  ;;  %p132_p0 = scmp.lt.u32.totalorder %s128_s28, %s196_s2 }
  0xc6   :  { %p134_p1 = pnand %p132_p0, %p129_p13 }
  0xc8   :  { %137 = shalt.err (!%p134_p1)
}
  0xc9   :  { %74 = dma.vmem_to_hbm [thread:$0]  %s69_s25, 128, %s196_s2, [#allocation4], %s143_s19, %s143_s19, %s144_s20  }
  0xca   :  { %140 = dma.done.wait [#allocation4], 128  }
  0xcb   :  { %141 = vsyncadd [#allocation4], 4294967168 }
  0xcc   :  { %78 = vsyncpa [#allocation3], 1 }
  0xcd   :  { %79 = vsyncpa [#allocation4], 1 }

</bundles_post_ra>
